<compile_context>
chip_gen: v7x
topology: tpu7x:2x2x1
jax: 0.10.0
libtpu: 0.0.40
codegen_flags: <defaults>
</compile_context>

<pallas_src>
import functools

import jax
import jax.numpy as jnp
from jax import lax
from jax.experimental import pallas as pl
from jax.experimental.pallas import tpu as pltpu


def _round_up(n: int, m: int) -> int:
    return (n + m - 1) // m * m


def _cdiv(a: int, b: int) -> int:
    return (a + b - 1) // b


def _choose_batch_tile(batch: int, batch_tile: int) -> int:
    """Lane-aligned batch tile; keeps >=2 grid steps when the batch allows it."""
    max_tile = max(128, (int(batch_tile) // 128) * 128)
    b_lanes = _round_up(batch, 128)
    tb = min(max_tile, b_lanes)
    if b_lanes >= 256:
        # Cap at ~half the batch so grid >= 2 (lets v7x use both TensorCores).
        tb = min(tb, _round_up(_cdiv(b_lanes, 2), 128))
    return max(tb, 128)


def _choose_chunk(tb: int, max_chunk: int) -> int:
    """Largest multiple-of-128 divisor of tb that is <= max_chunk."""
    max_chunk = max(128, (int(max_chunk) // 128) * 128)
    tc = min(tb, max_chunk)
    while tb % tc:
        tc -= 128
    return tc


def _mlp_kernel(xt_ref, w1t_ref, b1_ref, w2t_ref, b2_ref, ot_ref, *, chunk):
    # xt_ref:  [n_inputs, tb]      bf16   (batch on lanes, streamed)
    # w1t_ref: [hidden, n_inputs]  bf16   (resident across grid steps)
    # b1_ref:  [hidden, 1]         f32
    # w2t_ref: [n_actions, hidden] bf16   (resident)
    # b2_ref:  [n_actions, 1]      f32
    # ot_ref:  [n_actions, tb]     out_dtype
    w1t = w1t_ref[...]
    b1 = b1_ref[...]
    w2t = w2t_ref[...]
    b2 = b2_ref[...]

    tb = xt_ref.shape[1]
    n_chunks = tb // chunk

    if n_chunks == 1:
        # Whole tile at once (small tiles / tiny batches).
        h = jnp.dot(w1t, xt_ref[...], preferred_element_type=jnp.float32)
        h = jnp.maximum(h + b1, 0.0)
        o = jnp.dot(w2t, h.astype(jnp.bfloat16),
                    preferred_element_type=jnp.float32)
        ot_ref[...] = (o + b2).astype(ot_ref.dtype)
    else:
        # Lane-chunked compute: huge DMA tile, bounded [hidden, chunk]
        # intermediates (keeps vreg/VMEM pressure flat as tb grows).
        def one_chunk(c, carry):
            off = pl.multiple_of(c * chunk, 128)
            x_c = xt_ref[:, pl.ds(off, chunk)]
            h = jnp.dot(w1t, x_c, preferred_element_type=jnp.float32)
            h = jnp.maximum(h + b1, 0.0)
            o = jnp.dot(w2t, h.astype(jnp.bfloat16),
                        preferred_element_type=jnp.float32)
            ot_ref[:, pl.ds(off, chunk)] = (o + b2).astype(ot_ref.dtype)
            return carry

        lax.fori_loop(0, n_chunks, one_chunk, 0)


def policy_forward_transposed(x_t, w1, b1, w2, b2, *, batch_tile=65536,
                              chunk=8192, out_dtype=jnp.float32):
    """Transposed-layout (production) entry point.

    Args:
      x_t: [n_inputs, B] activations (batch on the trailing axis). Keep this
           in bf16 with B a multiple of the tile to avoid any wrapper passes.
    Returns:
      [n_actions, B] logits in `out_dtype`.
    """
    n_inputs, batch = x_t.shape
    hidden = w1.shape[1]
    n_actions = w2.shape[1]

    tb = _choose_batch_tile(batch, batch_tile)
    tc = _choose_chunk(tb, chunk)
    b_pad = _round_up(batch, tb)

    x_t_bf = x_t.astype(jnp.bfloat16)            # no-op if already bf16
    if b_pad != batch:
        x_t_bf = jnp.pad(x_t_bf, ((0, 0), (0, b_pad - batch)))

    w1_t = w1.T.astype(jnp.bfloat16)             # [hidden, n_inputs]
    w2_t = w2.T.astype(jnp.bfloat16)             # [n_actions, hidden]
    b1_c = b1.reshape(-1, 1).astype(jnp.float32)  # [hidden, 1]
    b2_c = b2.reshape(-1, 1).astype(jnp.float32)  # [n_actions, 1]

    # VMEM budget: double-buffered streamed blocks + resident weights +
    # in-kernel [hidden, chunk] intermediates, with 2x headroom (>=32 MiB so
    # v5e's 16 MiB default scoped limit never constrains the tile).
    out_itemsize = jnp.dtype(out_dtype).itemsize
    block_bytes = (n_inputs * tb * 2 + n_actions * tb * out_itemsize
                   + (hidden * n_inputs + n_actions * hidden) * 2
                   + (hidden + n_actions) * 4)
    interm_bytes = hidden * tc * (4 + 2) + 8 * tc * 4
    vmem_limit = int(min(max(32 << 20, 2 * (2 * block_bytes + interm_bytes)),
                         100 << 20))

    grid = (b_pad // tb,)
    out_t = pl.pallas_call(
        functools.partial(_mlp_kernel, chunk=tc),
        out_shape=jax.ShapeDtypeStruct((n_actions, b_pad), out_dtype),
        grid_spec=pltpu.PrefetchScalarGridSpec(
            num_scalar_prefetch=0,
            grid=grid,
            in_specs=[
                # Batch tiles stream through (default double-buffered).
                pl.BlockSpec((n_inputs, tb), lambda i: (0, i)),
                # Weights / biases: constant block index -> resident in VMEM.
                pl.BlockSpec((hidden, n_inputs), lambda i: (0, 0)),
                pl.BlockSpec((hidden, 1), lambda i: (0, 0)),
                pl.BlockSpec((n_actions, hidden), lambda i: (0, 0)),
                pl.BlockSpec((n_actions, 1), lambda i: (0, 0)),
            ],
            out_specs=pl.BlockSpec((n_actions, tb), lambda i: (0, i)),
        ),
        compiler_params=pltpu.CompilerParams(
            dimension_semantics=("parallel",),
            vmem_limit_bytes=vmem_limit,
        ),
    )(x_t_bf, w1_t, b1_c, w2_t, b2_c)

    if b_pad != batch:
        out_t = out_t[:, :batch]
    return out_t


def cross_entropy_policy_network(x, w1, b1, w2, b2, *, batch_tile=65536,
                                 chunk=8192, out_dtype=jnp.float32):
    """Torch-layout wrapper: x [B, n_inputs] -> logits [B, n_actions].

    One fused transpose(+pad+cast) pass on the way in, one transpose on the
    way out; jit the caller so XLA fuses them with the pallas_call operands.
    Prefer `policy_forward_transposed` in production to avoid both passes.
    """
    out_t = policy_forward_transposed(
        x.T, w1, b1, w2, b2,
        batch_tile=batch_tile, chunk=chunk, out_dtype=out_dtype)
    return out_t.T


def init_params(key, n_inputs, n_actions, hidden_size):
    """Mimics torch.nn.Linear default init: U(-1/sqrt(fan_in), +1/sqrt(fan_in))."""
    k1, k2, k3, k4 = jax.random.split(key, 4)
    lim1 = 1.0 / jnp.sqrt(jnp.float32(n_inputs))
    lim2 = 1.0 / jnp.sqrt(jnp.float32(hidden_size))
    w1 = jax.random.uniform(k1, (n_inputs, hidden_size), jnp.float32, -lim1, lim1)
    b1 = jax.random.uniform(k2, (hidden_size,), jnp.float32, -lim1, lim1)
    w2 = jax.random.uniform(k3, (hidden_size, n_actions), jnp.float32, -lim2, lim2)
    b2 = jax.random.uniform(k4, (n_actions,), jnp.float32, -lim2, lim2)
    return w1, b1, w2, b2


if __name__ == "__main__":
    # Small shapes consistent with a CEM policy net (CartPole-like env).
    batch = 8
    n_inputs = 4
    n_actions = 2
    hidden_size = 32

    key = jax.random.PRNGKey(0)
    kx, kp = jax.random.split(key)
    w1, b1, w2, b2 = init_params(kp, n_inputs, n_actions, hidden_size)

    def ref_forward(x):
        # Pure-JAX reference matching the kernel's bf16-operand / f32-accumulate path.
        bf = lambda a: a.astype(jnp.bfloat16).astype(jnp.float32)
        h = jnp.maximum(bf(x) @ bf(w1) + b1, 0.0)
        return bf(h) @ bf(w2) + b2

    fwd = jax.jit(lambda x: cross_entropy_policy_network(x, w1, b1, w2, b2))

    # 1) Tiny batch (original module shapes).
    x_small = jax.random.normal(kx, (batch, n_inputs), dtype=jnp.float32)
    out = jax.block_until_ready(fwd(x_small))
    assert out.shape == (batch, n_actions)
    assert jnp.allclose(out, ref_forward(x_small), atol=2e-3, rtol=2e-3)

    # 2) Non-aligned batch: exercises lane padding + >=2 grid steps ("parallel").
    x_mid = jax.random.normal(jax.random.PRNGKey(1), (300, n_inputs), jnp.float32)
    out_mid = jax.block_until_ready(fwd(x_mid))
    assert out_mid.shape == (300, n_actions)
    assert jnp.allclose(out_mid, ref_forward(x_mid), atol=2e-3, rtol=2e-3)

    # 3) Force the in-kernel lane-chunk loop (tile > chunk) at small cost.
    x_big = jax.random.normal(jax.random.PRNGKey(2), (600, n_inputs), jnp.float32)
    out_big = jax.block_until_ready(
        cross_entropy_policy_network(x_big, w1, b1, w2, b2,
                                     batch_tile=256, chunk=128))
    assert out_big.shape == (600, n_actions)
    assert jnp.allclose(out_big, ref_forward(x_big), atol=2e-3, rtol=2e-3)

    # 4) Transposed (production) entry point: no layout-conversion passes.
    out_t = jax.block_until_ready(
        policy_forward_transposed(x_mid.T, w1, b1, w2, b2))
    assert out_t.shape == (n_actions, 300)
    assert jnp.allclose(out_t.T, ref_forward(x_mid), atol=2e-3, rtol=2e-3)

    print("KERNEL_OK")
</pallas_src>

<mosaic_0001>
module attributes {stable_mosaic.version = 11 : i64} {
  func.func @_mlp_kernel(%arg0: i32, %arg1: memref<4x128xbf16, #tpu.memory_space<vmem>>, %arg2: memref<32x4xbf16, #tpu.memory_space<vmem>>, %arg3: memref<32x1xf32, #tpu.memory_space<vmem>>, %arg4: memref<2x32xbf16, #tpu.memory_space<vmem>>, %arg5: memref<2x1xf32, #tpu.memory_space<vmem>>, %arg6: memref<2x128xf32, #tpu.memory_space<vmem>>) attributes {dimension_semantics = [#tpu.dimension_semantics<parallel>], iteration_bounds = array<i64: 1>, scalar_prefetch = 0 : i64, scratch_operands = 0 : i64, tpu.core_type = #tpu.core_type<tc>, window_params = [{transform_indices = @transform_0, window_bounds = array<i64: 4, 128>}, {pipeline_mode = #tpu.pipeline_mode<synchronous>, transform_indices = @transform_1, window_bounds = array<i64: 32, 4>}, {pipeline_mode = #tpu.pipeline_mode<synchronous>, transform_indices = @transform_2, window_bounds = array<i64: 32, 1>}, {pipeline_mode = #tpu.pipeline_mode<synchronous>, transform_indices = @transform_3, window_bounds = array<i64: 2, 32>}, {pipeline_mode = #tpu.pipeline_mode<synchronous>, transform_indices = @transform_4, window_bounds = array<i64: 2, 1>}, {transform_indices = @transform_5, window_bounds = array<i64: 2, 128>}]} {
    %c0 = arith.constant 0 : index
    %c0_0 = arith.constant 0 : index
    %0 = vector.load %arg2[%c0, %c0_0] : memref<32x4xbf16, #tpu.memory_space<vmem>>, vector<32x4xbf16>
    %c0_1 = arith.constant 0 : index
    %c0_2 = arith.constant 0 : index
    %1 = vector.load %arg3[%c0_1, %c0_2] : memref<32x1xf32, #tpu.memory_space<vmem>>, vector<32x1xf32>
    %c0_3 = arith.constant 0 : index
    %c0_4 = arith.constant 0 : index
    %2 = vector.load %arg4[%c0_3, %c0_4] : memref<2x32xbf16, #tpu.memory_space<vmem>>, vector<2x32xbf16>
    %c0_5 = arith.constant 0 : index
    %c0_6 = arith.constant 0 : index
    %3 = vector.load %arg5[%c0_5, %c0_6] : memref<2x1xf32, #tpu.memory_space<vmem>>, vector<2x1xf32>
    %c0_7 = arith.constant 0 : index
    %c0_8 = arith.constant 0 : index
    %4 = vector.load %arg1[%c0_7, %c0_8] : memref<4x128xbf16, #tpu.memory_space<vmem>>, vector<4x128xbf16>
    %cst = arith.constant dense<0.000000e+00> : vector<32x128xf32>
    %5 = tpu.matmul %0, %4, %cst {dimension_numbers = #tpu.dot_dimension_numbers<[1], [0], [0], [1], [0, 0, 1, 1], [], []>} : vector<32x4xbf16>, vector<4x128xbf16>, vector<32x128xf32> -> vector<32x128xf32>
    %6 = vector.broadcast %1 : vector<32x1xf32> to vector<32x128xf32>
    %7 = arith.addf %5, %6 : vector<32x128xf32>
    %cst_9 = arith.constant 0.000000e+00 : f32
    %8 = vector.broadcast %cst_9 : f32 to vector<32x128xf32>
    %9 = arith.maximumf %7, %8 : vector<32x128xf32>
    %10 = arith.truncf %9 : vector<32x128xf32> to vector<32x128xbf16>
    %cst_10 = arith.constant dense<0.000000e+00> : vector<2x128xf32>
    %11 = tpu.matmul %2, %10, %cst_10 {dimension_numbers = #tpu.dot_dimension_numbers<[1], [0], [0], [1], [0, 0, 1, 1], [], []>} : vector<2x32xbf16>, vector<32x128xbf16>, vector<2x128xf32> -> vector<2x128xf32>
    %12 = vector.broadcast %3 : vector<2x1xf32> to vector<2x128xf32>
    %13 = arith.addf %11, %12 : vector<2x128xf32>
    %c0_11 = arith.constant 0 : index
    %c0_12 = arith.constant 0 : index
    %14 = vector.load %arg6[%c0_11, %c0_12] : memref<2x128xf32, #tpu.memory_space<vmem>>, vector<2x128xf32>
    tpu.vector_store %arg6[%c0_11, %c0_12], %13 {strides = array<i32>} : memref<2x128xf32, #tpu.memory_space<vmem>>, vector<2x128xf32>,
    return
  }
  func.func @transform_0(%arg0: i32) -> (i32, i32) {
    %c0_i32 = arith.constant 0 : i32
    %c0_i32_0 = arith.constant 0 : i32
    return %c0_i32, %arg0 : i32, i32
  }
  func.func @transform_1(%arg0: i32) -> (i32, i32) {
    %c0_i32 = arith.constant 0 : i32
    %c0_i32_0 = arith.constant 0 : i32
    %c0_i32_1 = arith.constant 0 : i32
    return %c0_i32, %c0_i32_0 : i32, i32
  }
  func.func @transform_2(%arg0: i32) -> (i32, i32) {
    %c0_i32 = arith.constant 0 : i32
    %c0_i32_0 = arith.constant 0 : i32
    %c0_i32_1 = arith.constant 0 : i32
    return %c0_i32, %c0_i32_0 : i32, i32
  }
  func.func @transform_3(%arg0: i32) -> (i32, i32) {
    %c0_i32 = arith.constant 0 : i32
    %c0_i32_0 = arith.constant 0 : i32
    %c0_i32_1 = arith.constant 0 : i32
    return %c0_i32, %c0_i32_0 : i32, i32
  }
  func.func @transform_4(%arg0: i32) -> (i32, i32) {
    %c0_i32 = arith.constant 0 : i32
    %c0_i32_0 = arith.constant 0 : i32
    %c0_i32_1 = arith.constant 0 : i32
    return %c0_i32, %c0_i32_0 : i32, i32
  }
  func.func @transform_5(%arg0: i32) -> (i32, i32) {
    %c0_i32 = arith.constant 0 : i32
    %c0_i32_0 = arith.constant 0 : i32
    return %c0_i32, %arg0 : i32, i32
  }
}

</mosaic_0001>

<bundles_post_ra>
// kernel: _lambda_.1
= control target key start
LH: loop header
LB: loop body
LE: loop exit
PB: predicated region body
PF: predicated region fallthrough
CT: control target
= control target key end

     0   :  { %10 = vsyncpa [#allocation3], 0  ;;  %s257_s18 = smov [#allocation2]   ;;  %s323_s0 = inlined_call_operand.vmem [shape: bf16[4,128], index: 0, kind: input, shape index: {}]   ;;  %s324_s1 = inlined_call_operand.vmem [shape: bf16[32,4], index: 1, kind: input, shape index: {}]   ;;  %s325_s2 = inlined_call_operand.hbm [shape: f32[32,1], index: 2, kind: input, shape index: {}]   ;;  %s326_s3 = inlined_call_operand.vmem [shape: bf16[2,32], index: 3, kind: input, shape index: {}]   ;;  %s327_s4 = inlined_call_operand.vmem [shape: f32[2,1], index: 4, kind: input, shape index: {}]   ;;  %s328_s5 = inlined_call_operand.vmem [shape: f32[2,128], index: 5, kind: output, shape index: {}]  }
   0x1   :  { %s20_s19 = sshll.u32 %s257_s18, 4  ;;  %s233_s22 = scalar_lea.hbm %s325_s2, 512  ;;  %s21_s19 = int_to_ptr.vmem [resolvable:$true] %s20_s19 }
   0x2   :  { %p234_p0 = scmp.ne.s32.totalorder %s325_s2, %s233_s22  ;;  %p237_p1 = scmp.lt.u32.totalorder %s233_s22, %s325_s2 }
   0x4   :  { %p239_p2 = pnand %p237_p1, %p234_p0 }
   0x6   :  { %242 = shalt.err (!%p239_p2)
}
   0x7   :  { %s243_s27 = scalar_lea.vmem %s21_s19, 512  ;;  %p248_p4 = scmp.lt.s32.totalorder %s21_s19, %s21_s19 }
   0x8   :  { %p244_p3 = scmp.ne.s32.totalorder %s21_s19, %s243_s27  ;;  %p249_p5 = scmp.lt.s32.totalorder %s243_s27, %s243_s27 }
   0xa   :  { %p250_p6 = por %p249_p5, %p248_p4 }
   0xc   :  { %p251_p7 = pnand %p250_p6, %p244_p3 }
   0xe   :  { %254 = shalt.err (!%p251_p7)
}
   0xf   :  { %s258_s28 = smov 128   ;;  %s259_s29 = smov 8  }
  0x10   :  { %26 = dma.hbm_to_vmem [thread:$0]  %s325_s2, 512, %s21_s19, [#allocation3], %s258_s28, %s258_s28, %s259_s29  }
  0x11   :  { %255 = dma.done.wait [#allocation3], 512  }
  0x12   :  { %256 = vsyncadd [#allocation3], 4294966784  ;;  %v260_v0 = vmov 0   ;;  %vm83_vm0 = vcmask 1041408   ;;  %vm76_vm1 = vcmask 31744   ;;  %v231_v3 = vld [vmem:[%s324_s1] sm:$0xff]  }
  0x13   :  { %229 = vset.pattern.permute.xlu0 %v260_v0  ;;  %230 = vset.pattern.permute.xlu1 %v260_v0  ;;  %v45_v1 = vld [vmem:[%s323_s0] sm:$0x3]  ;;  %v232_v4 = vld [vmem:[%s324_s1 + $0x8] sm:$0xff]   ;;  %v41_v6 = vld [vmem:[#allocation2 + $0x10] sm:$0xff]  ;;  %v261_v10 = vmov 0.0   ;;  %vm262_vm2 = vmmov 0  }
  0x14   :  { %222 = vmatprep.subr.msk.bf16.mxu0 %vm83_vm0, %v45_v1  ;;  %v85_v2 = vsel %vm83_vm0, %v45_v1, 0  ;;  %v39_v5 = vld [vmem:[#allocation2] sm:$0xff]  ;;  %210 = vmatprep.mubr.msk.bf16.mxu0 %vm76_vm1, %v231_v3  ;;  %v40_v7 = vld [vmem:[#allocation2 + $0x8] sm:$0xff]  ;;  %v42_v8 = vld [vmem:[#allocation2 + $0x18] sm:$0xff]  ;;  %vm147_vm3 = vcmask 261120  }
  0x15   :  { %209 = vmatpush3.bf16.msra.mxu0 %v85_v2  ;;  %48 = vperm.xlu0 %229, %v39_v5   ;;  %v44_v9 = vld [vmem:[%s327_s4] sm:$0x3] }
  0x16   :  { %58 = vperm.xlu1 %230, %v41_v6   ;;  %214 = vmatprep.subr.bf16.mxu1 %v261_v10  ;;  %v43_v29 = vld [vmem:[%s326_s3] sm:$0x1] }
  0x17   :  { %218 = vmatprep.mubr.msk.bf16.mxu1 %vm262_vm2, %v261_v10 }
  0x18   :  { %211 = vmatmul.mubr.msk.bf16.vlgmr.msra.gmra.mrb[0].mxu0 %vm76_vm1, %v232_v4 }
  0x19   :  { %53 = vperm.xlu0 %229, %v40_v7  }
  0x1a   :  { %63 = vperm.xlu1 %230, %v42_v8  }
  0x1d   :  { %144 = vperm.xlu0 %229, %v44_v9  }
  0x94   :  { %v49_v12 = vpop.permute.xlu0 %48 }
  0x95   :  { %v59_v11 = vpop.permute.xlu1 %58 }
  0x98   :  { %v54_v19 = vpop.permute.xlu0 %53 }
  0x99   :  { %v64_v14 = vpop.permute.xlu1 %63 }
  0x9c   :  { %v145_v30 = vpop.permute.xlu0 %144 }
  0xeb   :  { %v212_v13 = vpop.f32.mrb[0].mxu0 }
  0xec   :  { %v130_v15 = vadd.f32 %v212_v13, %v59_v11  ;;  %v121_v16 = vpop.f32.mrb[1].mxu0 }
  0xed   :  { %v122_v17 = vadd.f32 %v121_v16, %v49_v12  ;;  %v213_v18 = vpop.f32.mrb[2].mxu0 }
  0xee   :  { %v133_v20 = vadd.f32 %v213_v18, %v64_v14  ;;  %v124_v21 = vpop.f32.mrb[3].mxu0  ;;  %v138_v23 = vmax.f32 %v130_v15, 0.0 }
  0xef   :  { %v125_v22 = vadd.f32 %v124_v21, %v54_v19  ;;  %v136_v25 = vmax.f32 %v122_v17, 0.0 }
  0xf0   :  { %v139_v24 = vmax.f32 %v133_v20, 0.0 }
  0xf1   :  { %v137_v26 = vmax.f32 %v125_v22, 0.0 }
  0xf2   :  { %v141_v27 = vpack.c.bf16 %v139_v24, %v138_v23 }
  0xf3   :  { %v140_v28 = vpack.c.bf16 %v137_v26, %v136_v25 }
  0xf5   :  { %215 = vmatpush3.bf16.msra.mxu1 %v140_v28 }
  0xf6   :  { %216 = vmatprep.subr.bf16.mxu1 %v261_v10 }
  0xf9   :  { %217 = vmatpush3.bf16.msra.mxu1 %v141_v27 }
  0xfc   :  { %219 = vmatmul.mubr.msk.bf16.vlgmr.msra.gmra.mrb[0].mxu1 %vm147_vm3, %v43_v29 }
 0x1cf   :  { %v185_v31 = vpop.f32.mrb[0].mxu1 }
 0x1d0   :  { %v186_v32 = vadd.f32 %v185_v31, %v145_v30  ;;  %v220_v33 = vpop.f32.mrb[1].mxu1 }
 0x1d1   :  { %v188_v34 = vpop.f32.mrb[2].mxu1 }
 0x1d2   :  { %191 = vst [vmem:[%s328_s5] sm:$0x3] %v186_v32  ;;  %v221_v35 = vpop.f32.mrb[3].mxu1 }
 0x1d3   :  { %196 = vsyncpa [#allocation3], 1 }

</bundles_post_ra>
